<compile_context>
chip_gen: v7x
topology: tpu7x:2x2x1
jax: 0.10.0
libtpu: 0.0.40
codegen_flags: <defaults>
</compile_context>

<pallas_src>
import functools

import jax
import jax.numpy as jnp
from jax.experimental import pallas as pl
from jax.experimental.pallas import tpu as pltpu


# ----------------------------------------------------------------------------
# Pallas kernel: one decoder step for the whole (small) batch in a single block.
# ----------------------------------------------------------------------------
def decoder_step_kernel(
    emb_ref,      # [B, E]        f32   embedded + (identity) dropout tokens
    h_ref,        # [B, Hd]       f32   previous decoder hidden state
    enc_ref,      # [B, S, 2He]   f32   encoder outputs (batch-major)
    wa_e_ref,     # [2He, A]      bf16  attention Linear, encoder-output rows
    b_a_ref,      # [1, A]        f32
    w_hcat_ref,   # [Hd, A+3Hd]   bf16  [wa_h | w_hr | w_hz | w_hn]
    b_h3_ref,     # [1, 3Hd]      f32   [b_hr | b_hz | b_hn]
    w_ie_ref,     # [E, 3Hd]      bf16  rows 0:E   of packed [w_ir | w_iz | w_in]
    w_iw_ref,     # [2He, 3Hd]    bf16  rows E:din of packed [w_ir | w_iz | w_in]
    b_i3_ref,     # [1, 3Hd]      f32   [b_ir | b_iz | b_in]
    wo_h_ref,     # [Hd, Vp]      bf16  out Linear, GRU-output rows (V padded to Vp)
    wo_w_ref,     # [2He, Vp]     bf16  out Linear, weighted-encoder rows
    wo_e_ref,     # [E, Vp]       bf16  out Linear, embedded rows
    b_o_ref,      # [1, Vp]       f32
    logits_ref,   # [B, Vp]       f32   (output, lane-dense / padded vocab)
    hnew_ref,     # [B, Hd]       f32   (output)
):
    emb = emb_ref[...]                       # [B, E]    f32
    h = h_ref[...]                           # [B, Hd]   f32
    enc = enc_ref[...]                       # [B, S, 2He] f32
    B, S, EH2 = enc.shape
    A = b_a_ref.shape[1]
    Hd = h.shape[1]

    bf16 = jnp.bfloat16
    f32 = jnp.float32
    emb_bf = emb.astype(bf16)
    h_bf = h.astype(bf16)

    # ---- attention: softmax_S( sum_A tanh(cat(h, enc) @ Wa + b_a) ) ----
    # encoder projection as ONE flat 2-D matmul (no broadcast, no batched einsum)
    enc2d_bf = enc.reshape(B * S, EH2).astype(bf16)
    e_proj = jnp.dot(enc2d_bf, wa_e_ref[...],
                     preferred_element_type=f32).reshape(B, S, A)       # [B, S, A]

    # fused projection of h: [h_proj | gh_r | gh_z | gh_n] in one MXU pass
    hcat = jnp.dot(h_bf, w_hcat_ref[...], preferred_element_type=f32)   # [B, A+3Hd]
    h_proj = hcat[:, :A]                                                # [B, A]
    gh = hcat[:, A:] + b_h3_ref[...]                                    # [B, 3Hd]

    energy = jnp.tanh(e_proj + h_proj[:, None, :] + b_a_ref[...][None, :, :])
    scores = jnp.sum(energy, axis=2)                                    # [B, S]
    scores = scores - jnp.max(scores, axis=1, keepdims=True)
    p = jnp.exp(scores)
    attn = p * pl.reciprocal(jnp.sum(p, axis=1, keepdims=True), approx=True)  # [B, S]

    # ---- weighted encoder rep: sum_S attn * enc  -> [B, 2He] ----
    weighted = jnp.sum(attn[:, :, None] * enc, axis=1)                  # [B, 2He] f32
    w_bf = weighted.astype(bf16)

    # ---- single-step GRU (PyTorch nn.GRU semantics, gate order r, z, n) ----
    # packed input gates: no concat -- split matmul against row-slices of W_i
    gi = (jnp.dot(emb_bf, w_ie_ref[...], preferred_element_type=f32)
          + jnp.dot(w_bf, w_iw_ref[...], preferred_element_type=f32)
          + b_i3_ref[...])                                              # [B, 3Hd]

    r = jax.nn.sigmoid(gi[:, :Hd] + gh[:, :Hd])
    z = jax.nn.sigmoid(gi[:, Hd:2 * Hd] + gh[:, Hd:2 * Hd])
    n = jnp.tanh(gi[:, 2 * Hd:] + r * gh[:, 2 * Hd:])
    h_new = (1.0 - z) * n + z * h                                       # [B, Hd] f32

    # ---- output Linear over cat(output, weighted, embedded), single bias add ----
    logits = (jnp.dot(h_new.astype(bf16), wo_h_ref[...], preferred_element_type=f32)
              + jnp.dot(w_bf, wo_w_ref[...], preferred_element_type=f32)
              + jnp.dot(emb_bf, wo_e_ref[...], preferred_element_type=f32)
              + b_o_ref[...])                                           # [B, Vp]

    logits_ref[...] = logits
    hnew_ref[...] = h_new


# ----------------------------------------------------------------------------
# Wrapper (glue): embedding gather, permute encoder outputs, pack/pad weights,
# call the kernel, slice the padded vocab back.
# ----------------------------------------------------------------------------
@functools.partial(jax.jit, static_argnums=())
def decoder_forward(params, input_ids, decoder_hidden, encoder_output):
    # embedding lookup + dropout(identity, eval mode) stay in JAX glue (gather).
    emb = jnp.take(params['embedding'], input_ids, axis=0)          # [B, E]
    enc_bsd = jnp.transpose(encoder_output, (1, 0, 2))              # [B, S, 2He]

    B, E = emb.shape
    Hd = decoder_hidden.shape[1]
    V = params['b_o'].shape[1]
    Vp = max(128, ((V + 127) // 128) * 128)                         # lane-dense vocab
    pad_v = Vp - V

    bf16 = jnp.bfloat16

    # --- weight packing (all <=128 lanes per fused matmul, bf16 MXU operands) ---
    # h projections: [wa_h | w_hr | w_hz | w_hn]  -> [Hd, A+3Hd]
    w_hcat = jnp.concatenate(
        [params['wa_h'], params['w_hr'], params['w_hz'], params['w_hn']],
        axis=1).astype(bf16)
    b_h3 = jnp.concatenate([params['b_hr'], params['b_hz'], params['b_hn']], axis=1)
    # GRU input gates: [w_ir | w_iz | w_in] -> [din, 3Hd], split by rows (emb / weighted)
    w_i = jnp.concatenate([params['w_ir'], params['w_iz'], params['w_in']], axis=1)
    w_ie = w_i[:E].astype(bf16)
    w_iw = w_i[E:].astype(bf16)
    b_i3 = jnp.concatenate([params['b_ir'], params['b_iz'], params['b_in']], axis=1)
    # output Linear: pad vocab axis to Vp (lane-dense stores)
    wo_h = jnp.pad(params['wo_h'], ((0, 0), (0, pad_v))).astype(bf16)
    wo_w = jnp.pad(params['wo_w'], ((0, 0), (0, pad_v))).astype(bf16)
    wo_e = jnp.pad(params['wo_e'], ((0, 0), (0, pad_v))).astype(bf16)
    b_o = jnp.pad(params['b_o'], ((0, 0), (0, pad_v)))
    wa_e = params['wa_e'].astype(bf16)

    vmem = pl.BlockSpec(memory_space=pltpu.MemorySpace.VMEM)
    args = (emb, decoder_hidden, enc_bsd,
            wa_e, params['b_a'],
            w_hcat, b_h3,
            w_ie, w_iw, b_i3,
            wo_h, wo_w, wo_e, b_o)

    logits_p, h_new = pl.pallas_call(
        decoder_step_kernel,
        out_shape=(jax.ShapeDtypeStruct((B, Vp), jnp.float32),
                   jax.ShapeDtypeStruct((B, Hd), jnp.float32)),
        in_specs=[vmem] * len(args),
        out_specs=(vmem, vmem),
    )(*args)

    # TODO(synk): if used inside an autoregressive decode loop, hoist the token loop
    # into the kernel (grid axis + resident weights) to amortize launch/DMA overhead.
    return logits_p[:, :V], h_new


# ----------------------------------------------------------------------------
# Pure-JAX f32 reference (same math) for a sanity check.
# ----------------------------------------------------------------------------
def decoder_forward_ref(params, input_ids, decoder_hidden, encoder_output):
    emb = jnp.take(params['embedding'], input_ids, axis=0)
    enc = jnp.transpose(encoder_output, (1, 0, 2))
    h = decoder_hidden
    h_proj = h @ params['wa_h']
    e_proj = jnp.einsum('bsi,ia->bsa', enc, params['wa_e'])
    energy = jnp.tanh(e_proj + h_proj[:, None, :] + params['b_a'][None, :, :])
    scores = jnp.sum(energy, axis=2)
    attn = jax.nn.softmax(scores, axis=1)
    weighted = jnp.sum(attn[:, :, None] * enc, axis=1)
    x = jnp.concatenate([emb, weighted], axis=1)
    r = jax.nn.sigmoid(x @ params['w_ir'] + params['b_ir'] + h @ params['w_hr'] + params['b_hr'])
    z = jax.nn.sigmoid(x @ params['w_iz'] + params['b_iz'] + h @ params['w_hz'] + params['b_hz'])
    n = jnp.tanh(x @ params['w_in'] + params['b_in'] + r * (h @ params['w_hn'] + params['b_hn']))
    h_new = (1.0 - z) * n + z * h
    logits = (h_new @ params['wo_h'] + weighted @ params['wo_w']
              + emb @ params['wo_e'] + params['b_o'])
    return logits, h_new


# ----------------------------------------------------------------------------
# Deterministic parameter construction (synthetic, no checkpoint).
# ----------------------------------------------------------------------------
def init_params(key, dec_input_dim, emb_dim, enc_hid_dim, dec_hid_dim, attn_dim):
    V, E, He, Hd, A = dec_input_dim, emb_dim, enc_hid_dim, dec_hid_dim, attn_dim
    EH2 = 2 * He
    din = E + EH2                 # GRU input size

    names_shapes = [
        ('embedding', (V, E)),
        ('wa_h', (Hd, A)), ('wa_e', (EH2, A)), ('b_a', (1, A)),
        ('w_ir', (din, Hd)), ('w_iz', (din, Hd)), ('w_in', (din, Hd)),
        ('w_hr', (Hd, Hd)), ('w_hz', (Hd, Hd)), ('w_hn', (Hd, Hd)),
        ('b_ir', (1, Hd)), ('b_iz', (1, Hd)), ('b_in', (1, Hd)),
        ('b_hr', (1, Hd)), ('b_hz', (1, Hd)), ('b_hn', (1, Hd)),
        ('wo_h', (Hd, V)), ('wo_w', (EH2, V)), ('wo_e', (E, V)), ('b_o', (1, V)),
    ]
    keys = jax.random.split(key, len(names_shapes))
    params = {}
    for (name, shape), k in zip(names_shapes, keys):
        params[name] = 0.1 * jax.random.normal(k, shape, dtype=jnp.float32)
    return params


if __name__ == "__main__":
    # Small shapes consistent with the module.
    B = 2            # batch
    S = 8            # source sequence length
    V = 12           # dec_input_dim (target vocab)
    E = 16           # emb_dim
    He = 16          # enc_hid_dim  -> encoder_output feature dim = 2*He = 32
    Hd = 32          # dec_hid_dim
    A = 8            # attention attn_dim

    root = jax.random.PRNGKey(0)
    k_params, k_ids, k_hidden, k_enc = jax.random.split(root, 4)

    params = init_params(k_params, V, E, He, Hd, A)

    input_ids = jax.random.randint(k_ids, (B,), 0, V, dtype=jnp.int32)            # [B]
    decoder_hidden = jax.random.normal(k_hidden, (B, Hd), dtype=jnp.float32)      # [B, Hd]
    encoder_output = jax.random.normal(k_enc, (S, B, 2 * He), dtype=jnp.float32)  # [S, B, 2He]

    logits, h_new = decoder_forward(params, input_ids, decoder_hidden, encoder_output)
    logits, h_new = jax.block_until_ready((logits, h_new))

    ref_logits, ref_h = decoder_forward_ref(params, input_ids, decoder_hidden, encoder_output)
    max_diff = max(float(jnp.max(jnp.abs(logits - ref_logits))),
                   float(jnp.max(jnp.abs(h_new - ref_h))))
    # bf16 MXU operands with f32 accumulation -> allow 2e-2 vs the f32 reference.
    if not (max_diff < 2e-2):
        raise AssertionError(f"Pallas kernel mismatch vs reference, max |diff| = {max_diff}")

    print("KERNEL_OK")
</pallas_src>

<mosaic_0001>
module attributes {stable_mosaic.version = 11 : i64} {
  func.func @decoder_step_kernel(%arg0: memref<2x16xf32, #tpu.memory_space<vmem>>, %arg1: memref<2x32xf32, #tpu.memory_space<vmem>>, %arg2: memref<2x8x32xf32, #tpu.memory_space<vmem>>, %arg3: memref<32x8xbf16, #tpu.memory_space<vmem>>, %arg4: memref<1x8xf32, #tpu.memory_space<vmem>>, %arg5: memref<32x104xbf16, #tpu.memory_space<vmem>>, %arg6: memref<1x96xf32, #tpu.memory_space<vmem>>, %arg7: memref<16x96xbf16, #tpu.memory_space<vmem>>, %arg8: memref<32x96xbf16, #tpu.memory_space<vmem>>, %arg9: memref<1x96xf32, #tpu.memory_space<vmem>>, %arg10: memref<32x128xbf16, #tpu.memory_space<vmem>>, %arg11: memref<32x128xbf16, #tpu.memory_space<vmem>>, %arg12: memref<16x128xbf16, #tpu.memory_space<vmem>>, %arg13: memref<1x128xf32, #tpu.memory_space<vmem>>, %arg14: memref<2x128xf32, #tpu.memory_space<vmem>>, %arg15: memref<2x32xf32, #tpu.memory_space<vmem>>) attributes {dimension_semantics = [], scalar_prefetch = 0 : i64, scratch_operands = 0 : i64, tpu.core_type = #tpu.core_type<tc>} {
    %c0 = arith.constant 0 : index
    %c0_0 = arith.constant 0 : index
    %0 = vector.load %arg0[%c0, %c0_0] : memref<2x16xf32, #tpu.memory_space<vmem>>, vector<2x16xf32>
    %c0_1 = arith.constant 0 : index
    %c0_2 = arith.constant 0 : index
    %1 = vector.load %arg1[%c0_1, %c0_2] : memref<2x32xf32, #tpu.memory_space<vmem>>, vector<2x32xf32>
    %c0_3 = arith.constant 0 : index
    %c0_4 = arith.constant 0 : index
    %c0_5 = arith.constant 0 : index
    %2 = vector.load %arg2[%c0_3, %c0_4, %c0_5] : memref<2x8x32xf32, #tpu.memory_space<vmem>>, vector<2x8x32xf32>
    %3 = arith.truncf %0 : vector<2x16xf32> to vector<2x16xbf16>
    %4 = arith.truncf %1 : vector<2x32xf32> to vector<2x32xbf16>
    %5 = vector.shape_cast %2 : vector<2x8x32xf32> to vector<16x32xf32>
    %6 = arith.truncf %5 : vector<16x32xf32> to vector<16x32xbf16>
    %c0_6 = arith.constant 0 : index
    %c0_7 = arith.constant 0 : index
    %7 = vector.load %arg3[%c0_6, %c0_7] : memref<32x8xbf16, #tpu.memory_space<vmem>>, vector<32x8xbf16>
    %cst = arith.constant dense<0.000000e+00> : vector<16x8xf32>
    %8 = tpu.matmul %6, %7, %cst {dimension_numbers = #tpu.dot_dimension_numbers<[1], [0], [0], [1], [0, 0, 1, 1], [], []>} : vector<16x32xbf16>, vector<32x8xbf16>, vector<16x8xf32> -> vector<16x8xf32>
    %9 = vector.shape_cast %8 : vector<16x8xf32> to vector<2x8x8xf32>
    %c0_8 = arith.constant 0 : index
    %c0_9 = arith.constant 0 : index
    %10 = vector.load %arg5[%c0_8, %c0_9] : memref<32x104xbf16, #tpu.memory_space<vmem>>, vector<32x104xbf16>
    %cst_10 = arith.constant dense<0.000000e+00> : vector<2x104xf32>
    %11 = tpu.matmul %4, %10, %cst_10 {dimension_numbers = #tpu.dot_dimension_numbers<[1], [0], [0], [1], [0, 0, 1, 1], [], []>} : vector<2x32xbf16>, vector<32x104xbf16>, vector<2x104xf32> -> vector<2x104xf32>
    %12 = vector.extract_strided_slice %11 {offsets = [0, 0], sizes = [2, 8], strides = [1, 1]} : vector<2x104xf32> to vector<2x8xf32>
    %13 = vector.extract_strided_slice %11 {offsets = [0, 8], sizes = [2, 96], strides = [1, 1]} : vector<2x104xf32> to vector<2x96xf32>
    %c0_11 = arith.constant 0 : index
    %c0_12 = arith.constant 0 : index
    %14 = vector.load %arg6[%c0_11, %c0_12] : memref<1x96xf32, #tpu.memory_space<vmem>>, vector<1x96xf32>
    %15 = vector.broadcast %14 : vector<1x96xf32> to vector<2x96xf32>
    %16 = arith.addf %13, %15 : vector<2x96xf32>
    %17 = vector.shape_cast %12 : vector<2x8xf32> to vector<2x1x8xf32>
    %18 = vector.broadcast %17 : vector<2x1x8xf32> to vector<2x8x8xf32>
    %19 = arith.addf %9, %18 : vector<2x8x8xf32>
    %c0_13 = arith.constant 0 : index
    %c0_14 = arith.constant 0 : index
    %20 = vector.load %arg4[%c0_13, %c0_14] : memref<1x8xf32, #tpu.memory_space<vmem>>, vector<1x8xf32>
    %21 = vector.shape_cast %20 : vector<1x8xf32> to vector<1x1x8xf32>
    %22 = vector.broadcast %21 : vector<1x1x8xf32> to vector<2x8x8xf32>
    %23 = arith.addf %19, %22 : vector<2x8x8xf32>
    %24 = math.tanh %23 : vector<2x8x8xf32>
    %cst_15 = arith.constant dense<0.000000e+00> : vector<2x8xf32>
    %25 = vector.multi_reduction <add>, %24, %cst_15 [2] : vector<2x8x8xf32> to vector<2x8xf32>
    %cst_16 = arith.constant dense<0xFF800000> : vector<2xf32>
    %26 = vector.multi_reduction <maximumf>, %25, %cst_16 [1] : vector<2x8xf32> to vector<2xf32>
    %27 = vector.shape_cast %26 : vector<2xf32> to vector<2x1xf32>
    %28 = vector.broadcast %27 : vector<2x1xf32> to vector<2x8xf32>
    %29 = arith.subf %25, %28 : vector<2x8xf32>
    %30 = math.exp %29 : vector<2x8xf32>
    %cst_17 = arith.constant dense<0.000000e+00> : vector<2xf32>
    %31 = vector.multi_reduction <add>, %30, %cst_17 [1] : vector<2x8xf32> to vector<2xf32>
    %32 = vector.shape_cast %31 : vector<2xf32> to vector<2x1xf32>
    %33 = tpu.reciprocal %32 {approx = true} : vector<2x1xf32> -> vector<2x1xf32>
    %34 = vector.broadcast %33 : vector<2x1xf32> to vector<2x8xf32>
    %35 = arith.mulf %30, %34 : vector<2x8xf32>
    %36 = vector.shape_cast %35 : vector<2x8xf32> to vector<2x8x1xf32>
    %37 = vector.broadcast %36 : vector<2x8x1xf32> to vector<2x8x32xf32>
    %38 = arith.mulf %37, %2 : vector<2x8x32xf32>
    %cst_18 = arith.constant dense<0.000000e+00> : vector<2x32xf32>
    %39 = vector.multi_reduction <add>, %38, %cst_18 [1] : vector<2x8x32xf32> to vector<2x32xf32>
    %40 = arith.truncf %39 : vector<2x32xf32> to vector<2x32xbf16>
    %c0_19 = arith.constant 0 : index
    %c0_20 = arith.constant 0 : index
    %41 = vector.load %arg7[%c0_19, %c0_20] : memref<16x96xbf16, #tpu.memory_space<vmem>>, vector<16x96xbf16>
    %cst_21 = arith.constant dense<0.000000e+00> : vector<2x96xf32>
    %42 = tpu.matmul %3, %41, %cst_21 {dimension_numbers = #tpu.dot_dimension_numbers<[1], [0], [0], [1], [0, 0, 1, 1], [], []>} : vector<2x16xbf16>, vector<16x96xbf16>, vector<2x96xf32> -> vector<2x96xf32>
    %c0_22 = arith.constant 0 : index
    %c0_23 = arith.constant 0 : index
    %43 = vector.load %arg8[%c0_22, %c0_23] : memref<32x96xbf16, #tpu.memory_space<vmem>>, vector<32x96xbf16>
    %cst_24 = arith.constant dense<0.000000e+00> : vector<2x96xf32>
    %44 = tpu.matmul %40, %43, %cst_24 {dimension_numbers = #tpu.dot_dimension_numbers<[1], [0], [0], [1], [0, 0, 1, 1], [], []>} : vector<2x32xbf16>, vector<32x96xbf16>, vector<2x96xf32> -> vector<2x96xf32>
    %45 = arith.addf %42, %44 : vector<2x96xf32>
    %c0_25 = arith.constant 0 : index
    %c0_26 = arith.constant 0 : index
    %46 = vector.load %arg9[%c0_25, %c0_26] : memref<1x96xf32, #tpu.memory_space<vmem>>, vector<1x96xf32>
    %47 = vector.broadcast %46 : vector<1x96xf32> to vector<2x96xf32>
    %48 = arith.addf %45, %47 : vector<2x96xf32>
    %49 = vector.extract_strided_slice %48 {offsets = [0, 0], sizes = [2, 32], strides = [1, 1]} : vector<2x96xf32> to vector<2x32xf32>
    %50 = vector.extract_strided_slice %16 {offsets = [0, 0], sizes = [2, 32], strides = [1, 1]} : vector<2x96xf32> to vector<2x32xf32>
    %51 = arith.addf %49, %50 : vector<2x32xf32>
    %52 = arith.negf %51 : vector<2x32xf32>
    %53 = math.exp %52 : vector<2x32xf32>
    %cst_27 = arith.constant 1.000000e+00 : f32
    %54 = vector.broadcast %cst_27 : f32 to vector<2x32xf32>
    %55 = arith.addf %54, %53 : vector<2x32xf32>
    %56 = arith.divf %54, %55 : vector<2x32xf32>
    %57 = vector.extract_strided_slice %48 {offsets = [0, 32], sizes = [2, 32], strides = [1, 1]} : vector<2x96xf32> to vector<2x32xf32>
    %58 = vector.extract_strided_slice %16 {offsets = [0, 32], sizes = [2, 32], strides = [1, 1]} : vector<2x96xf32> to vector<2x32xf32>
    %59 = arith.addf %57, %58 : vector<2x32xf32>
    %60 = arith.negf %59 : vector<2x32xf32>
    %61 = math.exp %60 : vector<2x32xf32>
    %cst_28 = arith.constant 1.000000e+00 : f32
    %62 = vector.broadcast %cst_28 : f32 to vector<2x32xf32>
    %63 = arith.addf %62, %61 : vector<2x32xf32>
    %64 = arith.divf %62, %63 : vector<2x32xf32>
    %65 = vector.extract_strided_slice %48 {offsets = [0, 64], sizes = [2, 32], strides = [1, 1]} : vector<2x96xf32> to vector<2x32xf32>
    %66 = vector.extract_strided_slice %16 {offsets = [0, 64], sizes = [2, 32], strides = [1, 1]} : vector<2x96xf32> to vector<2x32xf32>
    %67 = arith.mulf %56, %66 : vector<2x32xf32>
    %68 = arith.addf %65, %67 : vector<2x32xf32>
    %69 = math.tanh %68 : vector<2x32xf32>
    %cst_29 = arith.constant 1.000000e+00 : f32
    %70 = vector.broadcast %cst_29 : f32 to vector<2x32xf32>
    %71 = arith.subf %70, %64 : vector<2x32xf32>
    %72 = arith.mulf %71, %69 : vector<2x32xf32>
    %73 = arith.mulf %64, %1 : vector<2x32xf32>
    %74 = arith.addf %72, %73 : vector<2x32xf32>
    %75 = arith.truncf %74 : vector<2x32xf32> to vector<2x32xbf16>
    %c0_30 = arith.constant 0 : index
    %c0_31 = arith.constant 0 : index
    %76 = vector.load %arg10[%c0_30, %c0_31] : memref<32x128xbf16, #tpu.memory_space<vmem>>, vector<32x128xbf16>
    %cst_32 = arith.constant dense<0.000000e+00> : vector<2x128xf32>
    %77 = tpu.matmul %75, %76, %cst_32 {dimension_numbers = #tpu.dot_dimension_numbers<[1], [0], [0], [1], [0, 0, 1, 1], [], []>} : vector<2x32xbf16>, vector<32x128xbf16>, vector<2x128xf32> -> vector<2x128xf32>
    %c0_33 = arith.constant 0 : index
    %c0_34 = arith.constant 0 : index
    %78 = vector.load %arg11[%c0_33, %c0_34] : memref<32x128xbf16, #tpu.memory_space<vmem>>, vector<32x128xbf16>
    %cst_35 = arith.constant dense<0.000000e+00> : vector<2x128xf32>
    %79 = tpu.matmul %40, %78, %cst_35 {dimension_numbers = #tpu.dot_dimension_numbers<[1], [0], [0], [1], [0, 0, 1, 1], [], []>} : vector<2x32xbf16>, vector<32x128xbf16>, vector<2x128xf32> -> vector<2x128xf32>
    %80 = arith.addf %77, %79 : vector<2x128xf32>
    %c0_36 = arith.constant 0 : index
    %c0_37 = arith.constant 0 : index
    %81 = vector.load %arg12[%c0_36, %c0_37] : memref<16x128xbf16, #tpu.memory_space<vmem>>, vector<16x128xbf16>
    %cst_38 = arith.constant dense<0.000000e+00> : vector<2x128xf32>
    %82 = tpu.matmul %3, %81, %cst_38 {dimension_numbers = #tpu.dot_dimension_numbers<[1], [0], [0], [1], [0, 0, 1, 1], [], []>} : vector<2x16xbf16>, vector<16x128xbf16>, vector<2x128xf32> -> vector<2x128xf32>
    %83 = arith.addf %80, %82 : vector<2x128xf32>
    %c0_39 = arith.constant 0 : index
    %c0_40 = arith.constant 0 : index
    %84 = vector.load %arg13[%c0_39, %c0_40] : memref<1x128xf32, #tpu.memory_space<vmem>>, vector<1x128xf32>
    %85 = vector.broadcast %84 : vector<1x128xf32> to vector<2x128xf32>
    %86 = arith.addf %83, %85 : vector<2x128xf32>
    %c0_41 = arith.constant 0 : index
    %c0_42 = arith.constant 0 : index
    %87 = vector.load %arg14[%c0_41, %c0_42] : memref<2x128xf32, #tpu.memory_space<vmem>>, vector<2x128xf32>
    tpu.vector_store %arg14[%c0_41, %c0_42], %86 {strides = array<i32>} : memref<2x128xf32, #tpu.memory_space<vmem>>, vector<2x128xf32>,
    %c0_43 = arith.constant 0 : index
    %c0_44 = arith.constant 0 : index
    %88 = vector.load %arg15[%c0_43, %c0_44] : memref<2x32xf32, #tpu.memory_space<vmem>>, vector<2x32xf32>
    tpu.vector_store %arg15[%c0_43, %c0_44], %74 {strides = array<i32>} : memref<2x32xf32, #tpu.memory_space<vmem>>, vector<2x32xf32>,
    return
  }
}

</mosaic_0001>

<bundles_post_ra>
// kernel: decoder_forward.1
= control target key start
LH: loop header
LB: loop body
LE: loop exit
PB: predicated region body
PF: predicated region fallthrough
CT: control target
= control target key end

     0   :  { %21 = vsyncpa [#allocation3], 0  ;;  %v895_v1 = vmov 0.0   ;;  %vm896_vm0 = vmmov 0   ;;  %vm75_vm1 = vcmask 261120   ;;  %s1144_s0 = inlined_call_operand.vmem [shape: f32[2,16], index: 0, kind: input, shape index: {}]   ;;  %s1145_s1 = inlined_call_operand.vmem [shape: f32[2,32], index: 1, kind: input, shape index: {}]   ;;  %s1146_s2 = inlined_call_operand.vmem [shape: f32[2,8,32], index: 2, kind: input, shape index: {}]   ;;  %s1147_s3 = inlined_call_operand.vmem [shape: bf16[32,8], index: 3, kind: input, shape index: {}]   ;;  %s1148_s4 = inlined_call_operand.vmem [shape: f32[1,8], index: 4, kind: input, shape index: {}]   ;;  %s1149_s5 = inlined_call_operand.vmem [shape: bf16[32,104], index: 5, kind: input, shape index: {}]   ;;  %s1150_s6 = inlined_call_operand.vmem [shape: f32[1,96], index: 6, kind: input, shape index: {}]   ;;  %s1151_s7 = inlined_call_operand.vmem [shape: bf16[16,96], index: 7, kind: input, shape index: {}]   ;;  %s1152_s8 = inlined_call_operand.vmem [shape: bf16[32,96], index: 8, kind: input, shape index: {}]   ;;  %s1153_s9 = inlined_call_operand.vmem [shape: f32[1,96], index: 9, kind: input, shape index: {}]   ;;  %s1154_s10 = inlined_call_operand.vmem [shape: bf16[32,128], index: 10, kind: input, shape index: {}]   ;;  %s1155_s11 = inlined_call_operand.vmem [shape: bf16[32,128], index: 11, kind: input, shape index: {}]   ;;  %s1156_s12 = inlined_call_operand.vmem [shape: bf16[16,128], index: 12, kind: input, shape index: {}]   ;;  %s1157_s13 = inlined_call_operand.vmem [shape: f32[1,128], index: 13, kind: input, shape index: {}]   ;;  %s1158_s14 = inlined_call_operand.hbm [shape: f32[2,128], index: 14, kind: output, shape index: {0}]   ;;  %s1159_s15 = inlined_call_operand.hbm [shape: f32[2,32], index: 15, kind: output, shape index: {1}]  }
   0x1   :  { %v819_v0 = vld [vmem:[%s1149_s5] sm:$0xff]   ;;  %761 = vmatprep.subr.bf16.mxu1 %v895_v1  ;;  %753 = vmatprep.subr.bf16.mxu0 %v895_v1  ;;  %v821_v3 = vld [vmem:[%s1149_s5 + $0x8] sm:$0xff]  }
   0x2   :  { %v820_v2 = vld [vmem:[%s1147_s3] sm:$0xff]   ;;  %762 = vmatpush3.bf16.msra.mxu1 %v819_v0  ;;  %765 = vmatprep.mubr.msk.bf16.mxu1 %vm896_vm0, %v895_v1  ;;  %v822_v4 = vld [vmem:[%s1147_s3 + $0x8] sm:$0xff]  }
   0x3   :  { %754 = vmatpush3.bf16.msra.mxu0 %v820_v2  ;;  %763 = vmatprep.subr.bf16.mxu1 %v895_v1  ;;  %v1008_v5 = vld [vmem:[%s1145_s1] sm:$0x3]  ;;  %v1020_v7 = vld [vmem:[%s1146_s2 + $0x8] sm:$0xff] }
   0x4   :  { %755 = vmatprep.subr.bf16.mxu0 %v895_v1  ;;  %757 = vmatprep.mubr.msk.bf16.mxu0 %vm896_vm0, %v895_v1  ;;  %v1015_v6 = vld [vmem:[%s1146_s2] sm:$0xff]  ;;  %v57_v8 = vpack.c.bf16 %v1008_v5, %v1008_v5 }
   0x5   :  { %v58_v9 = vpack.c.bf16 %v1020_v7, %v1015_v6 }
   0x6   :  { %764 = vmatpush3.bf16.msra.mxu1 %v821_v3 }
   0x7   :  { %756 = vmatpush3.bf16.msra.mxu0 %v822_v4  ;;  %777 = vmatprep.subr.bf16.mxu1 %v895_v1 }
   0x8   :  { %769 = vmatprep.subr.bf16.mxu0 %v895_v1 }
   0x9   :  { %766 = vmatmul.mubr.msk.bf16.vlgmr.msra.gmra.mrb[0].mxu1 %vm75_vm1, %v57_v8 }
   0xa   :  { %758 = vmatmul.mubr.msk.bf16.vlgmr.msra.gmra.mrb[0].mxu0 %vm75_vm1, %v58_v9  ;;  %779 = vmatprep.mubr.msk.bf16.mxu1 %vm896_vm0, %v895_v1 }
   0xb   :  { %22 = vsyncpa [#allocation5], 0  ;;  %773 = vmatprep.mubr.msk.bf16.mxu0 %vm896_vm0, %v895_v1  ;;  %v897_v10 = vmov 1966171168   ;;  %v193_v12 = vlaneseq  ;;  %v717_v30 = vld [vmem:[%s1148_s4] ss:$0 sm:$0xff] }
   0xc   :  { %v191_v11 = vunpack.c.l.s4 %v897_v10  ;;  %vm235_vm2 = vcmask 64512   ;;  %vm254_vm3 = vcmask 1041409   ;;  %vm257_vm4 = vcmask 58368   ;;  %v716_v2 = vld [vmem:[%s1150_s6] ss:$0 sm:$0xff]  ;;  %s899_s16 = smov 8  }
   0xd   :  { %v1034_v14 = vshrl.u32 %v193_v12, 7  ;;  %v245_v40 = vand.u32 127, %v193_v12  ;;  %v898_v48 = vmov 0   ;;  %s900_s17 = smov 120   ;;  %s901_s18 = smov 56   ;;  %vm414_vm5 = vcmask 130048  }
   0xe   :  { %v192_v13 = vunpack.c.0.s8 %v191_v11  ;;  %818 = vset.pattern.permute.xlu0 %v898_v48  ;;  %817 = vset.pattern.permute.xlu1 %v898_v48  ;;  %s904_s4 = smov 96   ;;  %vm680_vm6 = vcmask 254976  }
   0xf   :  { %v1041_v20 = vsub.s32 0, %v1034_v14  ;;  %v248_v42 = vsub.s32 %v245_v40, %v1034_v14  ;;  %v268_v49 = vsub.s32 1, %v1034_v14 }
  0x10   :  { %v195_v15 = vsub.s32 %v192_v13, %v1034_v14  ;;  %v823_v14 = vld [vmem:[%s1152_s8] sm:$0xff]  }
  0x11   :  { %770 = vmatpush3.bf16.msra.mxu0 %v823_v14 }
  0x12   :  { %771 = vmatprep.subr.bf16.mxu0 %v895_v1 }
  0xdc   :  { %v1037_v16 = vpop.f32.mrb[0].mxu1 }
  0xdd   :  { %v196_v17 = vrot.slane %v1037_v16, %v195_v15  ;;  %v767_v18 = vpop.f32.mrb[1].mxu1  ;;  %v113_v19 = vpop.f32.mrb[0].mxu0 }
  0xde   :  { %v176_v21 = vpop.f32.mrb[2].mxu1  ;;  %v759_v22 = vpop.f32.mrb[1].mxu0 }
  0xdf   :  { %v197_v23 = vcombine.high %v196_v17, %v196_v17  ;;  %v204_v24 = vrot.slane %v196_v17, %v195_v15  ;;  %v768_v25 = vpop.f32.mrb[3].mxu1  ;;  %v116_v26 = vpop.f32.mrb[2].mxu0  ;;  %v825_v17 = vld [vmem:[%s1152_s8 + $0x8] sm:$0xff]  }
  0xe0   :  { %v760_v27 = vpop.f32.mrb[3].mxu0  ;;  %772 = vmatpush3.bf16.msra.mxu0 %v825_v17 }
  0xe1   :  { %v215_v28 = vrot.slane %v204_v24, %v1041_v20  ;;  %v211_v29 = vrot.slane %v197_v23, %v195_v15  ;;  %v824_v15 = vld [vmem:[%s1151_s7] sm:$0xff]   ;;  %783 = vmatprep.subr.bf16.mxu0 %v895_v1  ;;  %s902_s7 = smov 32  }
  0xe2   :  { %778 = vmatpush3.bf16.msra.mxu1 %v824_v15 }
  0xe3   :  { %v222_v31 = vadd.f32 %v215_v28, %v113_v19  ;;  %v219_v32 = vrot.slane %v211_v29, %v1041_v20  ;;  %791 = vmatprep.subr.bf16.mxu1 %v895_v1 }
  0xe5   :  { %v231_v33 = vadd.f32 %v717_v30, %v222_v31  ;;  %v223_v34 = vadd.f32 %v219_v32, %v116_v26 }
  0xe7   :  { %831 = vtanh.f32 %v231_v33  ;;  %v232_v35 = vadd.f32 %v717_v30, %v223_v34 }
  0xe9   :  { %833 = vtanh.f32 %v232_v35 }
  0xf1   :  { %v832_v36 = vpop.eup %831 }
  0xf2   :  { %v236_v37 = vsel %vm235_vm2, %v832_v36, 0.0 }
  0xf3   :  { %v834_v38 = vpop.eup %833  ;;  %237 = vadd.xlane.f32.xlu0 %v236_v37 }
  0xf4   :  { %v239_v39 = vsel %vm235_vm2, %v834_v38, 0.0 }
  0xf7   :  { %240 = vadd.xlane.f32.xlu0 %v239_v39 }
 0x180   :  { %v238_v41 = vpop.xlane.xlu0 %237 }
 0x181   :  { %v249_v44 = vrot.slane %v238_v41, %v248_v42 }
 0x184   :  { %v241_v43 = vpop.xlane.xlu0 %240 }
 0x185   :  { %v253_v45 = vrot.slane %v241_v43, %v248_v42 }
 0x187   :  { %v255_v46 = vsel %vm254_vm3, %v253_v45, %v249_v44 }
 0x188   :  { %v258_v47 = vsel %vm257_vm4, %v255_v46, -inf }
 0x189   :  { %259 = vmax.xlane.f32.xlu1 %v258_v47  ;;  %v723_v47 = vld [vmem:[%s1153_s9] ss:$0 sm:$0xff]  ;;  %s903_s9 = smov 64  }
 0x216   :  { %v260_v50 = vpop.xlane.xlu1 %259 }
 0x217   :  { %v265_v51 = vrot.slane %v260_v50, %v1041_v20  ;;  %v269_v52 = vrot.slane %v260_v50, %v268_v49 }
 0x219   :  { %v272_v53 = vsub.f32 %v238_v41, %v265_v51  ;;  %v273_v54 = vsub.f32 %v241_v43, %v269_v52  ;;  %v827_v41 = vld [vmem:[%s1155_s11 + $0x8] sm:$0xff]  }
 0x21b   :  { %v274_v55 = vmul.f32 1.442695, %v272_v53  ;;  %v276_v56 = vmul.f32 1.442695, %v273_v54 }
 0x21d   :  { %835 = vpow2.f32 %v274_v55 }
 0x21e   :  { %837 = vpow2.f32 %v276_v56 }
 0x227   :  { %v836_v57 = vpop.eup %835 }
 0x228   :  { %v838_v58 = vpop.eup %837  ;;  %281 = vperm.xlu1 %817, %v836_v57  }
 0x229   :  { %284 = vperm.xlu0 %818, %v838_v58  }
 0x2a7   :  { %v282_v59 = vpop.permute.xlu1 %281 }
 0x2a8   :  { %v285_v60 = vpop.permute.xlu0 %284  ;;  %v289_v61 = vrot.slane %v282_v59, %v248_v42 }
 0x2a9   :  { %v293_v62 = vrot.slane %v285_v60, %v248_v42 }
 0x2ab   :  { %v294_v63 = vsel %vm254_vm3, %v293_v62, %v289_v61 }
 0x2ac   :  { %v296_v0 = vsel %vm257_vm4, %v294_v63, 0.0 }
 0x2ad   :  { %297 = vadd.xlane.f32.xlu1 %v296_v0 }
 0x2be   :  { %185 = vrot.lane.b32.xlu1 %v716_v2, %s899_s16 }
 0x2c2   :  { %494 = vrot.lane.b32.xlu1 %v1008_v5, %s902_s7 }
 0x33a   :  { %v298_v3 = vpop.xlane.xlu1 %297 }
 0x33b   :  { %839 = vrcp.f32 %v298_v3 }
 0x33e   :  { %v186_v12 = vpop.permute.xlu1 %185 }
 0x33f   :  { %v188_v13 = vadd.f32 %v186_v12, %v1037_v16  ;;  %v52_v16 = vld [vmem:[%s1144_s0] sm:$0x3] }
 0x340   :  { %v1073_v18 = vpack.c.bf16 %v52_v16, %v52_v16 }
 0x342   :  { %780 = vmatmul.mubr.msk.bf16.vlgmr.msra.gmra.mrb[4].mxu1 %vm414_vm5, %v1073_v18 }
 0x343   :  { %795 = vmatprep.mubr.msk.bf16.mxu1 %vm896_vm0, %v895_v1 }
 0x345   :  { %v840_v4 = vpop.eup %839 }
 0x346   :  { %v304_v8 = vrot.slane %v840_v4, %v1041_v20  ;;  %v308_v10 = vrot.slane %v840_v4, %v268_v49  ;;  %v828_v4 = vld [vmem:[%s1154_s10] sm:$0xff]  }
 0x347   :  { %792 = vmatpush3.bf16.msra.mxu1 %v828_v4 }
 0x348   :  { %v311_v9 = vmul.f32 %v836_v57, %v304_v8  ;;  %v312_v11 = vmul.f32 %v838_v58, %v308_v10  ;;  %v829_v8 = vld [vmem:[%s1156_s12] sm:$0xff]   ;;  %793 = vmatprep.subr.bf16.mxu1 %v895_v1 }
 0x34a   :  { %315 = vperm.xlu0 %818, %v311_v9   ;;  %v830_v9 = vld [vmem:[%s1154_s10 + $0x8] sm:$0xff]   ;;  %s905_s10 = smov [#allocation4]  }
 0x34b   :  { %794 = vmatpush3.bf16.msra.mxu1 %v830_v9  ;;  %s698_s12 = sshll.u32 %s905_s10, 4  ;;  %s699_s12 = int_to_ptr.vmem [resolvable:$true] %s698_s12 }
 0x34c   :  { %s847_s16 = scalar_lea.vmem %s699_s12, 32  ;;  %p852_p1 = scmp.lt.s32.totalorder %s699_s12, %s699_s12 }
 0x34d   :  { %p848_p0 = scmp.ne.s32.totalorder %s699_s12, %s847_s16  ;;  %p853_p2 = scmp.lt.s32.totalorder %s847_s16, %s847_s16 }
 0x34e   :  { %320 = vperm.xlu0 %818, %v312_v11   ;;  %v495_v11 = vpop.permute.xlu1 %494 }
 0x34f   :  { %p854_p3 = por %p853_p2, %p852_p1 }
 0x351   :  { %p855_p4 = pnand %p854_p3, %p848_p0 }
 0x352   :  { %467 = vrot.lane.b32.xlu0 %v188_v13, %s900_s17 }
 0x356   :  { %477 = vrot.lane.b32.xlu0 %v188_v13, %s901_s18 }
 0x3c9   :  { %v316_v19 = vpop.permute.xlu0 %315 }
 0x3ca   :  { %v323_v20 = vmul.f32 %v316_v19, %v1015_v6 }
 0x3cc   :  { %v325_v21 = vsel %vm75_vm1, %v323_v20, 0.0 }
 0x3cd   :  { %v326_v22 = vrot.slane %v325_v21, 4  ;;  %v321_v23 = vpop.permute.xlu0 %320 }
 0x3ce   :  { %v324_v24 = vmul.f32 %v321_v23, %v1020_v7  ;;  %v826_v7 = vld [vmem:[%s1155_s11] sm:$0xff]  }
 0x3cf   :  { %v327_v25 = vadd.f32 %v326_v22, %v325_v21 }
 0x3d0   :  { %v332_v26 = vsel %vm75_vm1, %v324_v24, 0.0 }
 0x3d1   :  { %v328_v27 = vrot.slane %v327_v25, 2  ;;  %v333_v28 = vrot.slane %v332_v26, 4  ;;  %v468_v53 = vpop.permute.xlu0 %467 }
 0x3d3   :  { %v329_v29 = vadd.f32 %v328_v27, %v327_v25  ;;  %v334_v30 = vadd.f32 %v333_v28, %v332_v26 }
 0x3d5   :  { %v330_v31 = vrot.slane %v329_v29, 1  ;;  %v335_v32 = vrot.slane %v334_v30, 2  ;;  %v478_v63 = vpop.permute.xlu0 %477 }
 0x3d7   :  { %v331_v33 = vadd.f32 %v330_v31, %v329_v29  ;;  %v336_v5 = vadd.f32 %v335_v32, %v334_v30 }
 0x3d9   :  { %v337_v34 = vrot.slane %v336_v5, 1  ;;  %v339_v35 = vpack.c.bf16 %v331_v33, %v331_v33 }
 0x3db   :  { %v338_v6 = vadd.f32 %v337_v34, %v336_v5  ;;  %v349_v37 = vunpack.c.l.b16 %v339_v35 }
 0x3dd   :  { %v340_v36 = vpack.c.bf16 %v338_v6, %v338_v6 }
 0x3df   :  { %v350_v38 = vunpack.c.l.b16 %v340_v36 }
 0x3e1   :  { %v351_v39 = vsel %vm254_vm3, %v350_v38, %v349_v37 }
 0x3e2   :  { %v352_v40 = vpack.c.b16 %v351_v39, %v351_v39 }
 0x3e4   :  { %774 = vmatmul.mubr.msk.bf16.vlgmr.msra.gmra.mrb[4].mxu0 %vm75_vm1, %v352_v40 }
 0x3e5   :  { %784 = vmatpush3.bf16.msra.mxu0 %v826_v7  ;;  %787 = vmatprep.mubr.msk.bf16.mxu0 %vm896_vm0, %v895_v1 }
 0x3e6   :  { %785 = vmatprep.subr.bf16.mxu0 %v895_v1 }
 0x3e9   :  { %786 = vmatpush3.bf16.msra.mxu0 %v827_v41 }
 0x3ea   :  { %799 = vmatprep.subr.bf16.mxu0 %v895_v1 }
 0x3ec   :  { %788 = vmatmul.mubr.msk.bf16.vlgmr.msra.gmra.mrb[8].mxu0 %vm75_vm1, %v352_v40 }
 0x3ed   :  { %801 = vmatprep.mubr.msk.bf16.mxu0 %vm896_vm0, %v895_v1  ;;  %800 = vmatpush3.bf16.msra.mxu0 %v829_v8 }
 0x3f4   :  { %802 = vmatmul.mubr.msk.bf16.vlgmr.msra.gmra.mrb[12].mxu0 %vm414_vm5, %v1073_v18 }
 0x415   :  { %v452_v42 = vpop.f32.mrb[4].mxu1 }
 0x416   :  { %v781_v43 = vpop.f32.mrb[5].mxu1 }
 0x417   :  { %v455_v44 = vpop.f32.mrb[6].mxu1 }
 0x418   :  { %v782_v45 = vpop.f32.mrb[7].mxu1 }
 0x4b7   :  { %v402_v46 = vpop.f32.mrb[4].mxu0 }
 0x4b8   :  { %v453_v48 = vadd.f32 %v452_v42, %v402_v46  ;;  %v775_v49 = vpop.f32.mrb[5].mxu0 }
 0x4b9   :  { %v405_v50 = vpop.f32.mrb[6].mxu0 }
 0x4ba   :  { %v465_v51 = vadd.f32 %v723_v47, %v453_v48  ;;  %v776_v52 = vpop.f32.mrb[7].mxu0 }
 0x4bc   :  { %v470_v54 = vadd.f32 %v468_v53, %v465_v51 }
 0x4be   :  { %v724_v55 = vmul.f32 -1.442695, %v470_v54 }
 0x4bf   :  { %v554_v56 = vpop.f32.mrb[8].mxu0 }
 0x4c0   :  { %841 = vpow2.f32 %v724_v55  ;;  %v789_v57 = vpop.f32.mrb[9].mxu0 }
 0x4c1   :  { %v557_v58 = vpop.f32.mrb[10].mxu0 }
 0x4c2   :  { %v790_v59 = vpop.f32.mrb[11].mxu0 }
 0x4c7   :  { %v660_v19 = vpop.f32.mrb[12].mxu0 }
 0x4c8   :  { %v803_v20 = vpop.f32.mrb[13].mxu0 }
 0x4c9   :  { %v663_v21 = vpop.f32.mrb[14].mxu0 }
 0x4ca   :  { %v842_v60 = vpop.eup %841  ;;  %v804_v1 = vpop.f32.mrb[15].mxu0 }
 0x4cb   :  { %v474_v61 = vadd.f32 1.0, %v842_v60 }
 0x4cd   :  { %843 = vrcp.f32 %v474_v61 }
 0x4d7   :  { %v844_v62 = vpop.eup %843 }
 0x4d8   :  { %v480_v0 = vmul.f32 %v844_v62, %v478_v63  ;;  %v487_v12 = vsub.f32 1.0, %v844_v62  ;;  %v497_v14 = vmul.f32 %v844_v62, %v495_v11 }
 0x4da   :  { %482 = vrot.lane.b32.xlu0 %v480_v0, %s903_s9 }
 0x54c   :  { %v483_v2 = vpop.permute.xlu0 %482 }
 0x54d   :  { %v485_v3 = vadd.f32 %v483_v2, %v465_v51 }
 0x54f   :  { %845 = vtanh.f32 %v485_v3 }
 0x559   :  { %v846_v10 = vpop.eup %845 }
 0x55a   :  { %489 = vrot.lane.b32.xlu0 %v846_v10, %s904_s4 }
 0x5cc   :  { %v490_v13 = vpop.permute.xlu0 %489 }
 0x5cd   :  { %v492_v15 = vmul.f32 %v490_v13, %v487_v12 }
 0x5cf   :  { %v498_v16 = vadd.f32 %v497_v14, %v492_v15 }
 0x5d1   :  { %677 = vrot.lane.b32.xlu1 %v498_v16, %s904_s4  ;;  %v499_v17 = vpack.c.bf16 %v498_v16, %v498_v16 }
 0x5d3   :  { %561 = vrot.lane.b32.xlu0 %v499_v17, %s904_s4 }
 0x643   :  { %v678_v22 = vpop.permute.xlu1 %677 }
 0x644   :  { %681 = vst.msk [vmem:[#allocation4] sm:$0x3] %vm680_vm6, %v678_v22 }
 0x645   :  { %v562_v18 = vpop.permute.xlu0 %561 }
 0x646   :  { %796 = vmatmul.mubr.msk.bf16.vlgmr.msra.gmra.mrb[8].mxu1 %vm75_vm1, %v562_v18 }
 0x647   :  { %858 = shalt.err (!%p855_p4)
}
 0x648   :  { %s859_s6 = scalar_lea.hbm %s1159_s15, 32 }
 0x649   :  { %p860_p5 = scmp.ne.s32.totalorder %s1159_s15, %s859_s6  ;;  %p863_p6 = scmp.lt.u32.totalorder %s859_s6, %s1159_s15 }
 0x64b   :  { %p865_p7 = pnand %p863_p6, %p860_p5 }
 0x64d   :  { %868 = shalt.err (!%p865_p7)
}
 0x64e   :  { %701 = dma.vmem_to_hbm [thread:$0]  %s699_s12, 32, %s1159_s15, [#allocation5]   ;;  %v733_v27 = vld [vmem:[%s1157_s13] ss:$0 sm:$0xff] }
 0x64f   :  { %s906_s0 = smov [#allocation2]  }
 0x650   :  { %s688_s8 = sshll.u32 %s906_s0, 4  ;;  %s689_s8 = int_to_ptr.vmem [resolvable:$true] %s688_s8 }
 0x651   :  { %s869_s26 = scalar_lea.vmem %s689_s8, 32  ;;  %p874_p9 = scmp.lt.s32.totalorder %s689_s8, %s689_s8 }
 0x652   :  { %p870_p8 = scmp.ne.s32.totalorder %s689_s8, %s869_s26  ;;  %p875_p10 = scmp.lt.s32.totalorder %s869_s26, %s869_s26 }
 0x654   :  { %p876_p11 = por %p875_p10, %p874_p9 }
 0x656   :  { %p877_p12 = pnand %p876_p11, %p870_p8 }
 0x719   :  { %v612_v23 = vpop.f32.mrb[8].mxu1 }
 0x71a   :  { %v613_v24 = vadd.f32 %v612_v23, %v554_v56  ;;  %v797_v25 = vpop.f32.mrb[9].mxu1 }
 0x71b   :  { %v615_v26 = vpop.f32.mrb[10].mxu1 }
 0x71c   :  { %v666_v28 = vadd.f32 %v660_v19, %v613_v24  ;;  %v798_v29 = vpop.f32.mrb[11].mxu1 }
 0x71e   :  { %v674_v30 = vadd.f32 %v733_v27, %v666_v28 }
 0x720   :  { %675 = vst [vmem:[#allocation2] sm:$0x3] %v674_v30 }
 0x721   :  { %880 = shalt.err (!%p877_p12)
}
 0x722   :  { %s881_s5 = scalar_lea.hbm %s1158_s14, 32 }
 0x723   :  { %p882_p13 = scmp.ne.s32.totalorder %s1158_s14, %s881_s5  ;;  %p885_p0 = scmp.lt.u32.totalorder %s881_s5, %s1158_s14 }
 0x725   :  { %p887_p1 = pnand %p885_p0, %p882_p13 }
 0x727   :  { %890 = shalt.err (!%p887_p1)
}
 0x728   :  { %691 = dma.vmem_to_hbm [thread:$0]  %s689_s8, 32, %s1158_s14, [#allocation3]  }
 0x729   :  { %891 = dma.done.wait [#allocation3], 32  }
 0x72a   :  { %892 = vsyncadd [#allocation3], 4294967264 }
 0x72b   :  { %893 = dma.done.wait [#allocation5], 32  }
 0x72c   :  { %894 = vsyncadd [#allocation5], 4294967264 }
 0x72d   :  { %708 = vsyncpa [#allocation3], 1 }
 0x72e   :  { %709 = vsyncpa [#allocation5], 1 }

</bundles_post_ra>
